<compile_context>
chip_gen: v5e
topology: v5e:2x2
jax: 0.10.0
libtpu: 0.0.40
codegen_flags: <defaults>
</compile_context>

<pallas_src>
import functools

import jax
import jax.numpy as jnp
from jax.experimental import pallas as pl
from jax.experimental.pallas import tpu as pltpu

LANE = 128      # vreg lane width
SUBLANE = 8     # vreg sublane count (f32)


def _round_up(n, m):
    return -(-n // m) * m


# ----------------------------------------------------------------------------
# Kernel: one grid step == one LSTM timestep.  Weights are resident in VMEM
# (constant index maps); h/c are carried in resident output blocks.
# ----------------------------------------------------------------------------
def lstm_decoder_kernel(x_ref, h0_ref, c0_ref, w_ih_ref, w_hh_ref, b_g_ref,
                        w_lin_ref, b_lin_ref,
                        out_ref, h_ref, c_ref, *, h_pad):
    t = pl.program_id(0)

    @pl.when(t == 0)
    def _():
        h_ref[...] = h0_ref[...]
        c_ref[...] = c0_ref[...]

    x = x_ref[0]                      # (B_pad, I_pad) bf16
    h_prev = h_ref[...]               # (B_pad, H_pad) f32, carried state
    c_prev = c_ref[...]

    # Two small bf16 MXU dots accumulated into one f32 result.
    gates = (jnp.dot(x, w_ih_ref[...], preferred_element_type=jnp.float32)
             + jnp.dot(h_prev.astype(jnp.bfloat16), w_hh_ref[...],
                       preferred_element_type=jnp.float32)
             + b_g_ref[...])          # (B_pad, 4*H_pad) f32

    H = h_pad                         # each gate slice is a full 128-lane block
    i_g = jax.nn.sigmoid(gates[:, 0 * H:1 * H])
    f_g = jax.nn.sigmoid(gates[:, 1 * H:2 * H])
    g_g = jnp.tanh(gates[:, 2 * H:3 * H])
    o_g = jax.nn.sigmoid(gates[:, 3 * H:4 * H])

    c_new = f_g * c_prev + i_g * g_g  # f32 elementwise (v5e-safe)
    h_new = o_g * jnp.tanh(c_new)

    c_ref[...] = c_new                # state written AFTER c_prev consumed
    h_ref[...] = h_new

    # Linear head: lane-dense 128-wide output store.
    out_ref[0] = (jnp.dot(h_new.astype(w_lin_ref.dtype), w_lin_ref[...],
                          preferred_element_type=jnp.float32)
                  + b_lin_ref[...])


def _lstm_steps(x_pad, h0_pad, c0_pad, params):
    """Run T LSTM steps in ONE pallas_call (grid over timesteps)."""
    T, B_pad, I_pad = x_pad.shape
    H_pad = h0_pad.shape[-1]
    O_pad = params["w_lin"].shape[1]

    kernel = functools.partial(lstm_decoder_kernel, h_pad=H_pad)
    const2 = lambda t: (0, 0)   # resident block: same index every step

    return pl.pallas_call(
        kernel,
        out_shape=(
            jax.ShapeDtypeStruct((T, B_pad, O_pad), jnp.float32),
            jax.ShapeDtypeStruct((B_pad, H_pad), jnp.float32),
            jax.ShapeDtypeStruct((B_pad, H_pad), jnp.float32),
        ),
        grid=(T,),
        in_specs=[
            pl.BlockSpec((1, B_pad, I_pad), lambda t: (t, 0, 0)),   # x_t
            pl.BlockSpec((B_pad, H_pad), const2),                   # h0
            pl.BlockSpec((B_pad, H_pad), const2),                   # c0
            pl.BlockSpec((I_pad, 4 * H_pad), const2),               # w_ih (resident)
            pl.BlockSpec((H_pad, 4 * H_pad), const2),               # w_hh (resident)
            pl.BlockSpec((1, 4 * H_pad), const2),                   # b_gates
            pl.BlockSpec((H_pad, O_pad), const2),                   # w_lin (resident)
            pl.BlockSpec((1, O_pad), const2),                       # b_lin
        ],
        out_specs=(
            pl.BlockSpec((1, B_pad, O_pad), lambda t: (t, 0, 0)),   # per-step out
            pl.BlockSpec((B_pad, H_pad), const2),                   # h carry
            pl.BlockSpec((B_pad, H_pad), const2),                   # c carry
        ),
        # In-place decode-state update: operand 1 (h0) -> output 1 (h_T),
        # operand 2 (c0) -> output 2 (c_T).  Safe: h0/c0 only read at t == 0,
        # resident state blocks written back at grid end.
        input_output_aliases={1: 1, 2: 2},
        compiler_params=pltpu.CompilerParams(
            dimension_semantics=("arbitrary",)),    # sequential recurrence
    )(x_pad, h0_pad, c0_pad,
      params["w_ih"], params["w_hh"], params["b_gates"],
      params["w_lin"], params["b_lin"])


# ----------------------------------------------------------------------------
# Padding helpers (done once per decode call, not per step).
# ----------------------------------------------------------------------------
def _pad_state(s, B_pad, H_pad):
    """(B, H) f32 -> zero-padded (B_pad, H_pad) f32 (padded lanes stay 0)."""
    B, H = s.shape
    return jnp.zeros((B_pad, H_pad), jnp.float32).at[:B, :H].set(s)


def _pad_inputs(xs, B_pad, I_pad):
    """(T, B, I) -> zero-padded (T, B_pad, I_pad) bf16."""
    T, B, I = xs.shape
    return jnp.zeros((T, B_pad, I_pad), jnp.bfloat16).at[:, :B, :I].set(
        xs.astype(jnp.bfloat16))


# ----------------------------------------------------------------------------
# Public wrappers
# ----------------------------------------------------------------------------
@functools.partial(jax.jit, static_argnames=("output_size",))
def lstm_decoder_forward(x, h0, c0, params, *, output_size):
    """Single decode step == LSTMDecoder.forward.

    x: (B, input_size); h0/c0: (1, B, hidden_size)   (num_layers = 1)
    returns (output (B, output_size), (h1 (1,B,H), c1 (1,B,H)))
    """
    B, _ = x.shape
    H = h0.shape[-1]
    I_pad = params["w_ih"].shape[0]
    H_pad = params["w_hh"].shape[0]
    B_pad = _round_up(B, SUBLANE)

    out, h1, c1 = _lstm_steps(
        _pad_inputs(x[None], B_pad, I_pad),
        _pad_state(h0[0], B_pad, H_pad),
        _pad_state(c0[0], B_pad, H_pad),
        params)
    return (out[0, :B, :output_size],
            (h1[:B, :H][None], c1[:B, :H][None]))


@functools.partial(jax.jit, static_argnames=("output_size",))
def lstm_decoder_decode(xs, h0, c0, params, *, output_size):
    """T decode steps in ONE kernel launch (the amortised variant).

    xs: (T, B, input_size).  The timestep loop runs inside the kernel;
    weights stay resident in VMEM; state is padded once here, not per step.
    """
    T, B, _ = xs.shape
    H = h0.shape[-1]
    I_pad = params["w_ih"].shape[0]
    H_pad = params["w_hh"].shape[0]
    B_pad = _round_up(B, SUBLANE)

    out, h1, c1 = _lstm_steps(
        _pad_inputs(xs, B_pad, I_pad),
        _pad_state(h0[0], B_pad, H_pad),
        _pad_state(c0[0], B_pad, H_pad),
        params)
    return (out[:, :B, :output_size],
            (h1[:B, :H][None], c1[:B, :H][None]))


def init_params(key, input_size, hidden_size, output_size):
    """PyTorch-style uniform(-1/sqrt(H), 1/sqrt(H)) init with ALL layout
    plumbing done once: transposed bf16 gate weights, each gate block
    lane-padded H -> 128, rows zero-padded, linear head weight+bias padded
    to a 128-lane output."""
    I, H, O = input_size, hidden_size, output_size
    I_pad, H_pad, O_pad = (_round_up(n, LANE) for n in (I, H, O))

    k = jax.random.split(key, 6)
    bound = 1.0 / float(H) ** 0.5
    u = lambda kk, shape: jax.random.uniform(kk, shape, jnp.float32, -bound, bound)

    w_ih = u(k[0], (I, 4 * H))      # == W_ih^T
    w_hh = u(k[1], (H, 4 * H))      # == W_hh^T
    b_gates = u(k[2], (1, 4 * H)) + u(k[3], (1, 4 * H))   # b_ih + b_hh
    w_lin = u(k[4], (H, O))         # == W_lin^T
    b_lin = u(k[5], (1, O))

    def pad_gate_cols(w):           # (rows, 4H) -> (rows, 4*H_pad), zero cols
        r = w.shape[0]
        return jnp.pad(w.reshape(r, 4, H),
                       ((0, 0), (0, 0), (0, H_pad - H))).reshape(r, 4 * H_pad)

    return {
        "w_ih": jnp.pad(pad_gate_cols(w_ih), ((0, I_pad - I), (0, 0))
                        ).astype(jnp.bfloat16),              # (I_pad, 4*H_pad)
        "w_hh": jnp.pad(pad_gate_cols(w_hh), ((0, H_pad - H), (0, 0))
                        ).astype(jnp.bfloat16),              # (H_pad, 4*H_pad)
        "b_gates": pad_gate_cols(b_gates),                   # (1, 4*H_pad) f32
        "w_lin": jnp.pad(w_lin, ((0, H_pad - H), (0, O_pad - O))
                         ).astype(jnp.bfloat16),             # (H_pad, O_pad)
        "b_lin": jnp.pad(b_lin, ((0, 0), (0, O_pad - O))),   # (1, O_pad) f32
    }


def _reference_steps(x_pad, h_pad_0, c_pad_0, params, H_pad):
    """Pure-JAX mirror of the kernel math (same padded layout, bf16 weights,
    f32 accumulate).  NOTE: this validates the kernel against its own
    numerics; vs. a true f32 PyTorch nn.LSTM there is an additional bf16
    weight-quantisation error (fidelity caveat, not a kernel bug)."""
    def step(carry, x_t):
        h, c = carry
        gates = (jnp.dot(x_t, params["w_ih"], preferred_element_type=jnp.float32)
                 + jnp.dot(h.astype(jnp.bfloat16), params["w_hh"],
                           preferred_element_type=jnp.float32)
                 + params["b_gates"])
        i = jax.nn.sigmoid(gates[:, 0 * H_pad:1 * H_pad])
        f = jax.nn.sigmoid(gates[:, 1 * H_pad:2 * H_pad])
        g = jnp.tanh(gates[:, 2 * H_pad:3 * H_pad])
        o = jax.nn.sigmoid(gates[:, 3 * H_pad:4 * H_pad])
        c_new = f * c + i * g
        h_new = o * jnp.tanh(c_new)
        out = (jnp.dot(h_new.astype(jnp.bfloat16), params["w_lin"],
                       preferred_element_type=jnp.float32) + params["b_lin"])
        return (h_new, c_new), out
    (h, c), outs = jax.lax.scan(step, (h_pad_0, c_pad_0), x_pad)
    return outs, h, c


if __name__ == "__main__":
    batch, input_size, hidden_size, output_size, seq = 2, 16, 32, 8, 8

    key = jax.random.PRNGKey(0)
    kx, kxs, kh, kc, kp = jax.random.split(key, 5)
    x = jax.random.normal(kx, (batch, input_size), jnp.float32)
    xs = jax.random.normal(kxs, (seq, batch, input_size), jnp.float32)
    h0 = jax.random.normal(kh, (1, batch, hidden_size), jnp.float32)
    c0 = jax.random.normal(kc, (1, batch, hidden_size), jnp.float32)
    params = init_params(kp, input_size, hidden_size, output_size)

    B_pad = _round_up(batch, SUBLANE)
    I_pad = _round_up(input_size, LANE)
    H_pad = _round_up(hidden_size, LANE)

    # --- single decode step (== LSTMDecoder.forward semantics) ---
    out, (h1, c1) = lstm_decoder_forward(x, h0, c0, params,
                                         output_size=output_size)
    jax.block_until_ready((out, h1, c1))
    assert out.shape == (batch, output_size)
    assert h1.shape == (1, batch, hidden_size)
    assert c1.shape == (1, batch, hidden_size)

    ro, rh, rc = _reference_steps(
        _pad_inputs(x[None], B_pad, I_pad),
        _pad_state(h0[0], B_pad, H_pad),
        _pad_state(c0[0], B_pad, H_pad), params, H_pad)
    assert jnp.allclose(out, ro[0, :batch, :output_size], rtol=1e-3, atol=1e-3)
    assert jnp.allclose(h1[0], rh[:batch, :hidden_size], rtol=1e-3, atol=1e-3)
    assert jnp.allclose(c1[0], rc[:batch, :hidden_size], rtol=1e-3, atol=1e-3)

    # --- multi-step decode: T timesteps inside ONE pallas_call ---
    outs, (hT, cT) = lstm_decoder_decode(xs, h0, c0, params,
                                         output_size=output_size)
    jax.block_until_ready((outs, hT, cT))
    assert outs.shape == (seq, batch, output_size)

    ro, rh, rc = _reference_steps(
        _pad_inputs(xs, B_pad, I_pad),
        _pad_state(h0[0], B_pad, H_pad),
        _pad_state(c0[0], B_pad, H_pad), params, H_pad)
    assert jnp.allclose(outs, ro[:, :batch, :output_size], rtol=1e-3, atol=1e-3)
    assert jnp.allclose(hT[0], rh[:batch, :hidden_size], rtol=1e-3, atol=1e-3)
    assert jnp.allclose(cT[0], rc[:batch, :hidden_size], rtol=1e-3, atol=1e-3)

    print("KERNEL_OK")
</pallas_src>

<mosaic_0001>
module attributes {stable_mosaic.version = 11 : i64} {
  func.func @lstm_decoder_kernel(%arg0: i32, %arg1: memref<1x8x128xbf16, #tpu.memory_space<vmem>>, %arg2: memref<8x128xf32, #tpu.memory_space<vmem>>, %arg3: memref<8x128xf32, #tpu.memory_space<vmem>>, %arg4: memref<128x512xbf16, #tpu.memory_space<vmem>>, %arg5: memref<128x512xbf16, #tpu.memory_space<vmem>>, %arg6: memref<1x512xf32, #tpu.memory_space<vmem>>, %arg7: memref<128x128xbf16, #tpu.memory_space<vmem>>, %arg8: memref<1x128xf32, #tpu.memory_space<vmem>>, %arg9: memref<1x8x128xf32, #tpu.memory_space<vmem>>, %arg10: memref<8x128xf32, #tpu.memory_space<vmem>>, %arg11: memref<8x128xf32, #tpu.memory_space<vmem>>) attributes {dimension_semantics = [#tpu.dimension_semantics<arbitrary>], iteration_bounds = array<i64: 1>, scalar_prefetch = 0 : i64, scratch_operands = 0 : i64, tpu.core_type = #tpu.core_type<tc>, window_params = [{transform_indices = @transform_0, window_bounds = array<i64: 1, 8, 128>}, {pipeline_mode = #tpu.pipeline_mode<synchronous>, transform_indices = @transform_1, window_bounds = array<i64: 8, 128>}, {pipeline_mode = #tpu.pipeline_mode<synchronous>, transform_indices = @transform_2, window_bounds = array<i64: 8, 128>}, {pipeline_mode = #tpu.pipeline_mode<synchronous>, transform_indices = @transform_3, window_bounds = array<i64: 128, 512>}, {pipeline_mode = #tpu.pipeline_mode<synchronous>, transform_indices = @transform_4, window_bounds = array<i64: 128, 512>}, {pipeline_mode = #tpu.pipeline_mode<synchronous>, transform_indices = @transform_5, window_bounds = array<i64: 1, 512>}, {pipeline_mode = #tpu.pipeline_mode<synchronous>, transform_indices = @transform_6, window_bounds = array<i64: 128, 128>}, {pipeline_mode = #tpu.pipeline_mode<synchronous>, transform_indices = @transform_7, window_bounds = array<i64: 1, 128>}, {transform_indices = @transform_8, window_bounds = array<i64: 1, 8, 128>}, {pipeline_mode = #tpu.pipeline_mode<synchronous>, transform_indices = @transform_9, window_bounds = array<i64: 8, 128>}, {pipeline_mode = #tpu.pipeline_mode<synchronous>, transform_indices = @transform_10, window_bounds = array<i64: 8, 128>}]} {
    %c0_i32 = arith.constant 0 : i32
    %0 = arith.cmpi eq, %arg0, %c0_i32 : i32
    %1 = arith.extui %0 : i1 to i32
    %c0_i32_0 = arith.constant 0 : i32
    %2 = arith.cmpi ne, %1, %c0_i32_0 : i32
    scf.if %2 {
      %c0_29 = arith.constant 0 : index
      %c0_30 = arith.constant 0 : index
      %52 = vector.load %arg2[%c0_29, %c0_30] : memref<8x128xf32, #tpu.memory_space<vmem>>, vector<8x128xf32>
      %c0_31 = arith.constant 0 : index
      %c0_32 = arith.constant 0 : index
      %53 = vector.load %arg10[%c0_31, %c0_32] : memref<8x128xf32, #tpu.memory_space<vmem>>, vector<8x128xf32>
      tpu.vector_store %arg10[%c0_31, %c0_32], %52 {strides = array<i32>} : memref<8x128xf32, #tpu.memory_space<vmem>>, vector<8x128xf32>,
      %c0_33 = arith.constant 0 : index
      %c0_34 = arith.constant 0 : index
      %54 = vector.load %arg3[%c0_33, %c0_34] : memref<8x128xf32, #tpu.memory_space<vmem>>, vector<8x128xf32>
      %c0_35 = arith.constant 0 : index
      %c0_36 = arith.constant 0 : index
      %55 = vector.load %arg11[%c0_35, %c0_36] : memref<8x128xf32, #tpu.memory_space<vmem>>, vector<8x128xf32>
      tpu.vector_store %arg11[%c0_35, %c0_36], %54 {strides = array<i32>} : memref<8x128xf32, #tpu.memory_space<vmem>>, vector<8x128xf32>,
    } else {
    }
    %c0 = arith.constant 0 : index
    %c0_1 = arith.constant 0 : index
    %c0_2 = arith.constant 0 : index
    %3 = vector.load %arg1[%c0, %c0_1, %c0_2] : memref<1x8x128xbf16, #tpu.memory_space<vmem>>, vector<1x8x128xbf16>
    %4 = vector.shape_cast %3 : vector<1x8x128xbf16> to vector<8x128xbf16>
    %c0_3 = arith.constant 0 : index
    %c0_4 = arith.constant 0 : index
    %5 = vector.load %arg10[%c0_3, %c0_4] : memref<8x128xf32, #tpu.memory_space<vmem>>, vector<8x128xf32>
    %c0_5 = arith.constant 0 : index
    %c0_6 = arith.constant 0 : index
    %6 = vector.load %arg11[%c0_5, %c0_6] : memref<8x128xf32, #tpu.memory_space<vmem>>, vector<8x128xf32>
    %c0_7 = arith.constant 0 : index
    %c0_8 = arith.constant 0 : index
    %7 = vector.load %arg4[%c0_7, %c0_8] : memref<128x512xbf16, #tpu.memory_space<vmem>>, vector<128x512xbf16>
    %cst = arith.constant dense<0.000000e+00> : vector<8x512xf32>
    %8 = tpu.matmul %4, %7, %cst {dimension_numbers = #tpu.dot_dimension_numbers<[1], [0], [0], [1], [0, 0, 1, 1], [], []>} : vector<8x128xbf16>, vector<128x512xbf16>, vector<8x512xf32> -> vector<8x512xf32>
    %9 = arith.truncf %5 : vector<8x128xf32> to vector<8x128xbf16>
    %c0_9 = arith.constant 0 : index
    %c0_10 = arith.constant 0 : index
    %10 = vector.load %arg5[%c0_9, %c0_10] : memref<128x512xbf16, #tpu.memory_space<vmem>>, vector<128x512xbf16>
    %cst_11 = arith.constant dense<0.000000e+00> : vector<8x512xf32>
    %11 = tpu.matmul %9, %10, %cst_11 {dimension_numbers = #tpu.dot_dimension_numbers<[1], [0], [0], [1], [0, 0, 1, 1], [], []>} : vector<8x128xbf16>, vector<128x512xbf16>, vector<8x512xf32> -> vector<8x512xf32>
    %12 = arith.addf %8, %11 : vector<8x512xf32>
    %c0_12 = arith.constant 0 : index
    %c0_13 = arith.constant 0 : index
    %13 = vector.load %arg6[%c0_12, %c0_13] : memref<1x512xf32, #tpu.memory_space<vmem>>, vector<1x512xf32>
    %14 = vector.broadcast %13 : vector<1x512xf32> to vector<8x512xf32>
    %15 = arith.addf %12, %14 : vector<8x512xf32>
    %16 = vector.extract_strided_slice %15 {offsets = [0, 0], sizes = [8, 128], strides = [1, 1]} : vector<8x512xf32> to vector<8x128xf32>
    %17 = arith.negf %16 : vector<8x128xf32>
    %18 = math.exp %17 : vector<8x128xf32>
    %cst_14 = arith.constant 1.000000e+00 : f32
    %19 = vector.broadcast %cst_14 : f32 to vector<8x128xf32>
    %20 = arith.addf %19, %18 : vector<8x128xf32>
    %21 = arith.divf %19, %20 : vector<8x128xf32>
    %22 = vector.extract_strided_slice %15 {offsets = [0, 128], sizes = [8, 128], strides = [1, 1]} : vector<8x512xf32> to vector<8x128xf32>
    %23 = arith.negf %22 : vector<8x128xf32>
    %24 = math.exp %23 : vector<8x128xf32>
    %cst_15 = arith.constant 1.000000e+00 : f32
    %25 = vector.broadcast %cst_15 : f32 to vector<8x128xf32>
    %26 = arith.addf %25, %24 : vector<8x128xf32>
    %27 = arith.divf %25, %26 : vector<8x128xf32>
    %28 = vector.extract_strided_slice %15 {offsets = [0, 256], sizes = [8, 128], strides = [1, 1]} : vector<8x512xf32> to vector<8x128xf32>
    %29 = math.tanh %28 : vector<8x128xf32>
    %30 = vector.extract_strided_slice %15 {offsets = [0, 384], sizes = [8, 128], strides = [1, 1]} : vector<8x512xf32> to vector<8x128xf32>
    %31 = arith.negf %30 : vector<8x128xf32>
    %32 = math.exp %31 : vector<8x128xf32>
    %cst_16 = arith.constant 1.000000e+00 : f32
    %33 = vector.broadcast %cst_16 : f32 to vector<8x128xf32>
    %34 = arith.addf %33, %32 : vector<8x128xf32>
    %35 = arith.divf %33, %34 : vector<8x128xf32>
    %36 = arith.mulf %27, %6 : vector<8x128xf32>
    %37 = arith.mulf %21, %29 : vector<8x128xf32>
    %38 = arith.addf %36, %37 : vector<8x128xf32>
    %39 = math.tanh %38 : vector<8x128xf32>
    %40 = arith.mulf %35, %39 : vector<8x128xf32>
    %c0_17 = arith.constant 0 : index
    %c0_18 = arith.constant 0 : index
    %41 = vector.load %arg11[%c0_17, %c0_18] : memref<8x128xf32, #tpu.memory_space<vmem>>, vector<8x128xf32>
    tpu.vector_store %arg11[%c0_17, %c0_18], %38 {strides = array<i32>} : memref<8x128xf32, #tpu.memory_space<vmem>>, vector<8x128xf32>,
    %c0_19 = arith.constant 0 : index
    %c0_20 = arith.constant 0 : index
    %42 = vector.load %arg10[%c0_19, %c0_20] : memref<8x128xf32, #tpu.memory_space<vmem>>, vector<8x128xf32>
    tpu.vector_store %arg10[%c0_19, %c0_20], %40 {strides = array<i32>} : memref<8x128xf32, #tpu.memory_space<vmem>>, vector<8x128xf32>,
    %43 = arith.truncf %40 : vector<8x128xf32> to vector<8x128xbf16>
    %c0_21 = arith.constant 0 : index
    %c0_22 = arith.constant 0 : index
    %44 = vector.load %arg7[%c0_21, %c0_22] : memref<128x128xbf16, #tpu.memory_space<vmem>>, vector<128x128xbf16>
    %cst_23 = arith.constant dense<0.000000e+00> : vector<8x128xf32>
    %45 = tpu.matmul %43, %44, %cst_23 {dimension_numbers = #tpu.dot_dimension_numbers<[1], [0], [0], [1], [0, 0, 1, 1], [], []>} : vector<8x128xbf16>, vector<128x128xbf16>, vector<8x128xf32> -> vector<8x128xf32>
    %c0_24 = arith.constant 0 : index
    %c0_25 = arith.constant 0 : index
    %46 = vector.load %arg8[%c0_24, %c0_25] : memref<1x128xf32, #tpu.memory_space<vmem>>, vector<1x128xf32>
    %47 = vector.broadcast %46 : vector<1x128xf32> to vector<8x128xf32>
    %48 = arith.addf %45, %47 : vector<8x128xf32>
    %c0_26 = arith.constant 0 : index
    %c0_27 = arith.constant 0 : index
    %c0_28 = arith.constant 0 : index
    %49 = vector.load %arg9[%c0_26, %c0_27, %c0_28] : memref<1x8x128xf32, #tpu.memory_space<vmem>>, vector<1x8x128xf32>
    %50 = vector.shape_cast %49 : vector<1x8x128xf32> to vector<8x128xf32>
    %51 = vector.shape_cast %48 : vector<8x128xf32> to vector<1x8x128xf32>
    tpu.vector_store %arg9[%c0_26, %c0_27, %c0_28], %51 {strides = array<i32>} : memref<1x8x128xf32, #tpu.memory_space<vmem>>, vector<1x8x128xf32>,
    return
  }
  func.func @transform_0(%arg0: i32) -> (i32, i32, i32) {
    %c0_i32 = arith.constant 0 : i32
    %c0_i32_0 = arith.constant 0 : i32
    %c0_i32_1 = arith.constant 0 : i32
    return %arg0, %c0_i32, %c0_i32_0 : i32, i32, i32
  }
  func.func @transform_1(%arg0: i32) -> (i32, i32) {
    %c0_i32 = arith.constant 0 : i32
    %c0_i32_0 = arith.constant 0 : i32
    %c0_i32_1 = arith.constant 0 : i32
    return %c0_i32, %c0_i32_0 : i32, i32
  }
  func.func @transform_2(%arg0: i32) -> (i32, i32) {
    %c0_i32 = arith.constant 0 : i32
    %c0_i32_0 = arith.constant 0 : i32
    %c0_i32_1 = arith.constant 0 : i32
    return %c0_i32, %c0_i32_0 : i32, i32
  }
  func.func @transform_3(%arg0: i32) -> (i32, i32) {
    %c0_i32 = arith.constant 0 : i32
    %c0_i32_0 = arith.constant 0 : i32
    %c0_i32_1 = arith.constant 0 : i32
    return %c0_i32, %c0_i32_0 : i32, i32
  }
  func.func @transform_4(%arg0: i32) -> (i32, i32) {
    %c0_i32 = arith.constant 0 : i32
    %c0_i32_0 = arith.constant 0 : i32
    %c0_i32_1 = arith.constant 0 : i32
    return %c0_i32, %c0_i32_0 : i32, i32
  }
  func.func @transform_5(%arg0: i32) -> (i32, i32) {
    %c0_i32 = arith.constant 0 : i32
    %c0_i32_0 = arith.constant 0 : i32
    %c0_i32_1 = arith.constant 0 : i32
    return %c0_i32, %c0_i32_0 : i32, i32
  }
  func.func @transform_6(%arg0: i32) -> (i32, i32) {
    %c0_i32 = arith.constant 0 : i32
    %c0_i32_0 = arith.constant 0 : i32
    %c0_i32_1 = arith.constant 0 : i32
    return %c0_i32, %c0_i32_0 : i32, i32
  }
  func.func @transform_7(%arg0: i32) -> (i32, i32) {
    %c0_i32 = arith.constant 0 : i32
    %c0_i32_0 = arith.constant 0 : i32
    %c0_i32_1 = arith.constant 0 : i32
    return %c0_i32, %c0_i32_0 : i32, i32
  }
  func.func @transform_8(%arg0: i32) -> (i32, i32, i32) {
    %c0_i32 = arith.constant 0 : i32
    %c0_i32_0 = arith.constant 0 : i32
    %c0_i32_1 = arith.constant 0 : i32
    return %arg0, %c0_i32, %c0_i32_0 : i32, i32, i32
  }
  func.func @transform_9(%arg0: i32) -> (i32, i32) {
    %c0_i32 = arith.constant 0 : i32
    %c0_i32_0 = arith.constant 0 : i32
    %c0_i32_1 = arith.constant 0 : i32
    return %c0_i32, %c0_i32_0 : i32, i32
  }
  func.func @transform_10(%arg0: i32) -> (i32, i32) {
    %c0_i32 = arith.constant 0 : i32
    %c0_i32_0 = arith.constant 0 : i32
    %c0_i32_1 = arith.constant 0 : i32
    return %c0_i32, %c0_i32_0 : i32, i32
  }
}

</mosaic_0001>

<bundles_post_ra>
// kernel: lstm_decoder_forward.1
= control target key start
LH: loop header
LB: loop body
LE: loop exit
PB: predicated region body
PF: predicated region fallthrough
CT: control target
= control target key end

     0   :  { %16 = vsyncpa [#allocation3], 0  ;;  %s1313_s0 = inlined_call_operand.vmem [shape: bf16[1,8,128], index: 0, kind: input, shape index: {}]   ;;  %s1314_s1 = inlined_call_operand.vmem [shape: f32[8,128], index: 1, kind: input, shape index: {}, may-alias: {1,9}]   ;;  %s1315_s2 = inlined_call_operand.vmem [shape: f32[8,128], index: 2, kind: input, shape index: {}, may-alias: {2,10}]   ;;  %s1316_s3 = inlined_call_operand.hbm [shape: bf16[128,512], index: 3, kind: input, shape index: {}]   ;;  %s1317_s4 = inlined_call_operand.hbm [shape: bf16[128,512], index: 4, kind: input, shape index: {}]   ;;  %s1318_s5 = inlined_call_operand.vmem [shape: f32[1,512], index: 5, kind: input, shape index: {}]   ;;  %s1319_s6 = inlined_call_operand.hbm [shape: bf16[128,128], index: 6, kind: input, shape index: {}]   ;;  %s1320_s7 = inlined_call_operand.vmem [shape: f32[1,128], index: 7, kind: input, shape index: {}]   ;;  %s1321_s8 = inlined_call_operand.vmem [shape: f32[1,8,128], index: 8, kind: output, shape index: {0}]   ;;  %s1322_s9 = inlined_call_operand.vmem [shape: f32[8,128], index: 9, kind: output, shape index: {1}, may-alias: {1,9}]   ;;  %s1323_s10 = inlined_call_operand.vmem [shape: f32[8,128], index: 10, kind: output, shape index: {2}, may-alias: {2,10}]  }
   0x1   :  { %17 = vsyncpa [#allocation5], 0  ;;  %s41_s15 = sshll.u32 %s1317_s4, 4  ;;  %s1218_s16 = smov [#allocation4]   ;;  %s42_s15 = int_to_ptr.hbm [resolvable:$true] %s41_s15 }
   0x2   :  { %s43_s17 = sshll.u32 %s1218_s16, 4  ;;  %s28_s20 = sshll.u32 %s1316_s3, 4  ;;  %s44_s17 = int_to_ptr.vmem [resolvable:$true] %s43_s17  ;;  %s29_s20 = int_to_ptr.hbm [resolvable:$true] %s28_s20 }
   0x3   :  { %s1219_s21 = smov 256   ;;  %s1220_s22 = smov 16  }
   0x4   :  { %49 = dma.hbm_to_vmem [thread:$0]  %s42_s15, 4096, %s44_s17, [#allocation5], %s1219_s21, %s1219_s21, %s1220_s22  }
   0x5   :  { %s1221_s23 = smov [#allocation2]   ;;  %s56_s27 = sshll.u32 %s1319_s6, 4  ;;  %s57_s27 = int_to_ptr.hbm [resolvable:$true] %s56_s27 }
   0x6   :  { %s30_s24 = sshll.u32 %s1221_s23, 4  ;;  %s1222_s4 = smov [#allocation6]   ;;  %s31_s24 = int_to_ptr.vmem [resolvable:$true] %s30_s24 }
   0x7   :  { %36 = dma.hbm_to_vmem [thread:$0]  %s29_s20, 4096, %s31_s24, [#allocation3], %s1219_s21, %s1219_s21, %s1220_s22  }
   0x8   :  { %s58_s28 = sshll.u32 %s1222_s4, 4  ;;  %s1223_s29 = smov 64   ;;  %s59_s28 = int_to_ptr.vmem [resolvable:$true] %s58_s28 }
   0x9   :  { %s1224_s30 = smov 4  }
   0xa   :  { %64 = dma.hbm_to_vmem [thread:$0]  %s57_s27, 1024, %s59_s28, [#allocation5], %s1223_s29, %s1223_s29, %s1224_s30  }
   0xb   :  { %1214 = dma.done.wait [#allocation3], 4096  }
   0xc   :  { %1215 = vsyncadd [#allocation3], 4294963200 }
   0xd   :  { %1216 = dma.done.wait [#allocation5], 5120  }
   0xe   :  { %1217 = vsyncadd [#allocation5], 4294962176  ;;  %v869_v0 = vld [vmem:[#allocation4 + $0xe0] sm:$0xf]  ;;  %v1108_v1 = vld [vmem:[#allocation4 + $0xec] sm:$0xf0] }
   0xf   :  { %v1106_v2 = vld [vmem:[#allocation4 + $0xe4] sm:$0xf]  ;;  %v870_v3 = vor.u32 %v1108_v1, %v869_v0  ;;  %v871_v4 = vld [vmem:[#allocation4 + $0xf0] sm:$0xf0]  ;;  %v877_v5 = vld [vmem:[#allocation4 + $0xe8] sm:$0xf] }
  0x10   :  { %v1109_v6 = vld [vmem:[#allocation4 + $0xf4] sm:$0xf0]  ;;  %v874_v7 = vor.u32 %v1106_v2, %v871_v4  ;;  %v1107_v9 = vld [vmem:[#allocation4 + $0xec] sm:$0xf]  ;;  %v879_v10 = vld [vmem:[#allocation4 + $0xf8] sm:$0xf0] }
  0x11   :  { %v878_v8 = vor.u32 %v1109_v6, %v877_v5  ;;  %v853_v11 = vld [vmem:[#allocation4 + $0xc0] sm:$0xf]  ;;  %315 = vmatpush.bf16.msra.mxu0 %v870_v3  ;;  %v882_v12 = vor.u32 %v1107_v9, %v879_v10  ;;  %v1104_v13 = vld [vmem:[#allocation4 + $0xcc] sm:$0xf0]  ;;  %v1102_v14 = vld [vmem:[#allocation4 + $0xc4] sm:$0xf] }
  0x12   :  { %v855_v15 = vld [vmem:[#allocation4 + $0xd0] sm:$0xf0]  ;;  %328 = vmatpush.bf16.msra.mxu1 %v874_v7  ;;  %v854_v16 = vor.u32 %v1104_v13, %v853_v11  ;;  %v861_v18 = vld [vmem:[#allocation4 + $0xc8] sm:$0xf]  ;;  %v1105_v19 = vld [vmem:[#allocation4 + $0xd4] sm:$0xf0] }
  0x13   :  { %341 = vmatpush.bf16.msra.mxu2 %v878_v8  ;;  %v858_v17 = vor.u32 %v1102_v14, %v855_v15  ;;  %v1103_v20 = vld [vmem:[#allocation4 + $0xcc] sm:$0xf]  ;;  %354 = vmatpush.bf16.msra.mxu3 %v882_v12  ;;  %v862_v21 = vor.u32 %v1105_v19, %v861_v18  ;;  %v863_v22 = vld [vmem:[#allocation4 + $0xd8] sm:$0xf0]  ;;  %v837_v23 = vld [vmem:[#allocation4 + $0xa0] sm:$0xf] }
  0x14   :  { %v1100_v24 = vld [vmem:[#allocation4 + $0xac] sm:$0xf0]  ;;  %v866_v25 = vor.u32 %v1103_v20, %v863_v22  ;;  %v1098_v26 = vld [vmem:[#allocation4 + $0xa4] sm:$0xf]  ;;  %v839_v27 = vld [vmem:[#allocation4 + $0xb0] sm:$0xf0] }
  0x15   :  { %v845_v28 = vld [vmem:[#allocation4 + $0xa8] sm:$0xf]  ;;  %316 = vmatpush.bf16.msra.mxu0 %v854_v16  ;;  %v838_v29 = vor.u32 %v1100_v24, %v837_v23  ;;  %v1101_v30 = vld [vmem:[#allocation4 + $0xb4] sm:$0xf0]  ;;  %v1099_v31 = vld [vmem:[#allocation4 + $0xac] sm:$0xf]  ;;  %v842_v33 = vor.u32 %v1098_v26, %v839_v27 }
  0x16   :  { %v847_v32 = vld [vmem:[#allocation4 + $0xb8] sm:$0xf0]  ;;  %329 = vmatpush.bf16.msra.mxu1 %v858_v17  ;;  %v846_v34 = vor.u32 %v1101_v30, %v845_v28  ;;  %v821_v35 = vld [vmem:[#allocation4 + $0x80] sm:$0xf]  ;;  %v1096_v36 = vld [vmem:[#allocation4 + $0x8c] sm:$0xf0] }
  0x17   :  { %342 = vmatpush.bf16.msra.mxu2 %v862_v21  ;;  %v1094_v37 = vld [vmem:[#allocation4 + $0x84] sm:$0xf]  ;;  %355 = vmatpush.bf16.msra.mxu3 %v866_v25  ;;  %v850_v38 = vor.u32 %v1099_v31, %v847_v32  ;;  %v823_v39 = vld [vmem:[#allocation4 + $0x90] sm:$0xf0]  ;;  %v829_v40 = vld [vmem:[#allocation4 + $0x88] sm:$0xf]  ;;  %v822_v44 = vor.u32 %v1096_v36, %v821_v35 }
  0x18   :  { %v1097_v41 = vld [vmem:[#allocation4 + $0x94] sm:$0xf0]  ;;  %v1095_v42 = vld [vmem:[#allocation4 + $0x8c] sm:$0xf]  ;;  %v831_v43 = vld [vmem:[#allocation4 + $0x98] sm:$0xf0]  ;;  %v826_v45 = vor.u32 %v1094_v37, %v823_v39 }
  0x19   :  { %317 = vmatpush.bf16.msra.mxu0 %v838_v29  ;;  %v830_v46 = vor.u32 %v1097_v41, %v829_v40  ;;  %v805_v47 = vld [vmem:[#allocation4 + $0x60] sm:$0xf]  ;;  %v1092_v48 = vld [vmem:[#allocation4 + $0x6c] sm:$0xf0]  ;;  %v1090_v49 = vld [vmem:[#allocation4 + $0x64] sm:$0xf]  ;;  %v834_v50 = vor.u32 %v1095_v42, %v831_v43 }
  0x1a   :  { %330 = vmatpush.bf16.msra.mxu1 %v842_v33  ;;  %v807_v51 = vld [vmem:[#allocation4 + $0x70] sm:$0xf0]  ;;  %v813_v52 = vld [vmem:[#allocation4 + $0x68] sm:$0xf]  ;;  %v1093_v53 = vld [vmem:[#allocation4 + $0x74] sm:$0xf0]  ;;  %v806_v56 = vor.u32 %v1092_v48, %v805_v47 }
  0x1b   :  { %343 = vmatpush.bf16.msra.mxu2 %v846_v34  ;;  %356 = vmatpush.bf16.msra.mxu3 %v850_v38  ;;  %v1091_v54 = vld [vmem:[#allocation4 + $0x6c] sm:$0xf]  ;;  %v815_v55 = vld [vmem:[#allocation4 + $0x78] sm:$0xf0]  ;;  %v810_v57 = vor.u32 %v1090_v49, %v807_v51  ;;  %v814_v58 = vor.u32 %v1093_v53, %v813_v52  ;;  %v789_v59 = vld [vmem:[#allocation4 + $0x40] sm:$0xf] }
  0x1c   :  { %v1088_v60 = vld [vmem:[#allocation4 + $0x4c] sm:$0xf0]  ;;  %v1086_v61 = vld [vmem:[#allocation4 + $0x44] sm:$0xf]  ;;  %v818_v62 = vor.u32 %v1091_v54, %v815_v55  ;;  %v791_v63 = vld [vmem:[#allocation4 + $0x50] sm:$0xf0] }
  0x1d   :  { %318 = vmatpush.bf16.msra.mxu0 %v822_v44  ;;  %v797_v0 = vld [vmem:[#allocation4 + $0x48] sm:$0xf]  ;;  %v1089_v1 = vld [vmem:[#allocation4 + $0x54] sm:$0xf0]  ;;  %v1087_v2 = vld [vmem:[#allocation4 + $0x4c] sm:$0xf]  ;;  %v790_v4 = vor.u32 %v1088_v60, %v789_v59  ;;  %v794_v5 = vor.u32 %v1086_v61, %v791_v63 }
  0x1e   :  { %331 = vmatpush.bf16.msra.mxu1 %v826_v45  ;;  %v799_v3 = vld [vmem:[#allocation4 + $0x58] sm:$0xf0]  ;;  %v798_v6 = vor.u32 %v1089_v1, %v797_v0  ;;  %v773_v7 = vld [vmem:[#allocation4 + $0x20] sm:$0xf]  ;;  %v1084_v8 = vld [vmem:[#allocation4 + $0x2c] sm:$0xf0] }
  0x1f   :  { %344 = vmatpush.bf16.msra.mxu2 %v830_v46  ;;  %357 = vmatpush.bf16.msra.mxu3 %v834_v50  ;;  %v1082_v9 = vld [vmem:[#allocation4 + $0x24] sm:$0xf]  ;;  %v802_v10 = vor.u32 %v1087_v2, %v799_v3  ;;  %v775_v11 = vld [vmem:[#allocation4 + $0x30] sm:$0xf0]  ;;  %v781_v12 = vld [vmem:[#allocation4 + $0x28] sm:$0xf]  ;;  %v774_v16 = vor.u32 %v1084_v8, %v773_v7 }
  0x20   :  { %v1085_v13 = vld [vmem:[#allocation4 + $0x34] sm:$0xf0]  ;;  %v1083_v14 = vld [vmem:[#allocation4 + $0x2c] sm:$0xf]  ;;  %v783_v15 = vld [vmem:[#allocation4 + $0x38] sm:$0xf0]  ;;  %v778_v19 = vor.u32 %v1082_v9, %v775_v11 }
  0x21   :  { %319 = vmatpush.bf16.msra.mxu0 %v806_v56  ;;  %v757_v17 = vld [vmem:[#allocation4] sm:$0xf]  ;;  %v1080_v18 = vld [vmem:[#allocation4 + $0xc] sm:$0xf0]  ;;  %v782_v20 = vor.u32 %v1085_v13, %v781_v12  ;;  %v1078_v21 = vld [vmem:[#allocation4 + $0x4] sm:$0xf]  ;;  %v786_v24 = vor.u32 %v1083_v14, %v783_v15 }
  0x22   :  { %332 = vmatpush.bf16.msra.mxu1 %v810_v57  ;;  %v759_v22 = vld [vmem:[#allocation4 + $0x10] sm:$0xf0]  ;;  %v765_v23 = vld [vmem:[#allocation4 + $0x8] sm:$0xf]  ;;  %v1081_v25 = vld [vmem:[#allocation4 + $0x14] sm:$0xf0]  ;;  %v758_v31 = vor.u32 %v1080_v18, %v757_v17 }
  0x23   :  { %345 = vmatpush.bf16.msra.mxu2 %v814_v58  ;;  %358 = vmatpush.bf16.msra.mxu3 %v818_v62  ;;  %v1079_v26 = vld [vmem:[#allocation4 + $0xc] sm:$0xf]  ;;  %v767_v27 = vld [vmem:[#allocation4 + $0x18] sm:$0xf0]  ;;  %v997_v28 = vld [vmem:[#allocation2 + $0xe0] sm:$0xf]  ;;  %v762_v35 = vor.u32 %v1078_v21, %v759_v22  ;;  %v766_v36 = vor.u32 %v1081_v25, %v765_v23 }
  0x24   :  { %v1076_v29 = vld [vmem:[#allocation2 + $0xec] sm:$0xf0]  ;;  %v1074_v30 = vld [vmem:[#allocation2 + $0xe4] sm:$0xf]  ;;  %v999_v32 = vld [vmem:[#allocation2 + $0xf0] sm:$0xf0]  ;;  %v770_v40 = vor.u32 %v1079_v26, %v767_v27 }
  0x25   :  { %320 = vmatpush.bf16.msra.mxu0 %v790_v4  ;;  %v1005_v33 = vld [vmem:[#allocation2 + $0xe8] sm:$0xf]  ;;  %v1077_v34 = vld [vmem:[#allocation2 + $0xf4] sm:$0xf0]  ;;  %v1075_v37 = vld [vmem:[#allocation2 + $0xec] sm:$0xf]  ;;  %v998_v41 = vor.u32 %v1076_v29, %v997_v28  ;;  %v1002_v42 = vor.u32 %v1074_v30, %v999_v32 }
  0x26   :  { %333 = vmatpush.bf16.msra.mxu1 %v794_v5  ;;  %v1007_v38 = vld [vmem:[#allocation2 + $0xf8] sm:$0xf0]  ;;  %v83_v39 = vld [vmem:[%s1314_s1] sm:$0xff]  ;;  %v1006_v43 = vor.u32 %v1077_v34, %v1005_v33  ;;  %v1072_v45 = vld [vmem:[#allocation2 + $0xcc] sm:$0xf0] }
  0x27   :  { %346 = vmatpush.bf16.msra.mxu2 %v798_v6  ;;  %359 = vmatpush.bf16.msra.mxu3 %v802_v10  ;;  %v981_v44 = vld [vmem:[#allocation2 + $0xc0] sm:$0xf]  ;;  %v1070_v46 = vld [vmem:[#allocation2 + $0xc4] sm:$0xf]  ;;  %v1010_v47 = vor.u32 %v1075_v37, %v1007_v38  ;;  %v983_v48 = vld [vmem:[#allocation2 + $0xd0] sm:$0xf0]  ;;  %v122_v51 = vpack.c.bf16 %v83_v39, %v83_v39 }
  0x28   :  { %v989_v49 = vld [vmem:[#allocation2 + $0xc8] sm:$0xf]  ;;  %v1073_v50 = vld [vmem:[#allocation2 + $0xd4] sm:$0xf0]  ;;  %v1071_v52 = vld [vmem:[#allocation2 + $0xcc] sm:$0xf]  ;;  %v982_v54 = vor.u32 %v1072_v45, %v981_v44  ;;  %v986_v55 = vor.u32 %v1070_v46, %v983_v48 }
  0x29   :  { %321 = vmatpush.bf16.msra.mxu0 %v774_v16  ;;  %v991_v53 = vld [vmem:[#allocation2 + $0xd8] sm:$0xf0]  ;;  %v990_v56 = vor.u32 %v1073_v50, %v989_v49  ;;  %v965_v57 = vld [vmem:[#allocation2 + $0xa0] sm:$0xf]  ;;  %v1068_v58 = vld [vmem:[#allocation2 + $0xac] sm:$0xf0] }
  0x2a   :  { %334 = vmatpush.bf16.msra.mxu1 %v778_v19  ;;  %v1066_v59 = vld [vmem:[#allocation2 + $0xa4] sm:$0xf]  ;;  %v994_v60 = vor.u32 %v1071_v52, %v991_v53  ;;  %v967_v61 = vld [vmem:[#allocation2 + $0xb0] sm:$0xf0]  ;;  %v973_v62 = vld [vmem:[#allocation2 + $0xa8] sm:$0xf]  ;;  %v966_v2 = vor.u32 %v1068_v58, %v965_v57 }
  0x2b   :  { %347 = vmatpush.bf16.msra.mxu2 %v782_v20  ;;  %360 = vmatpush.bf16.msra.mxu3 %v786_v24  ;;  %v1069_v63 = vld [vmem:[#allocation2 + $0xb4] sm:$0xf0]  ;;  %v1067_v0 = vld [vmem:[#allocation2 + $0xac] sm:$0xf]  ;;  %v975_v1 = vld [vmem:[#allocation2 + $0xb8] sm:$0xf0]  ;;  %v970_v3 = vor.u32 %v1066_v59, %v967_v61 }
  0x2c   :  { %v974_v4 = vor.u32 %v1069_v63, %v973_v62  ;;  %v949_v5 = vld [vmem:[#allocation2 + $0x80] sm:$0xf]  ;;  %v1064_v6 = vld [vmem:[#allocation2 + $0x8c] sm:$0xf0]  ;;  %v1062_v7 = vld [vmem:[#allocation2 + $0x84] sm:$0xf]  ;;  %v978_v8 = vor.u32 %v1067_v0, %v975_v1 }
  0x2d   :  { %322 = vmatpush.bf16.msra.mxu0 %v758_v31  ;;  %v951_v9 = vld [vmem:[#allocation2 + $0x90] sm:$0xf0]  ;;  %v957_v10 = vld [vmem:[#allocation2 + $0x88] sm:$0xf]  ;;  %v1065_v11 = vld [vmem:[#allocation2 + $0x94] sm:$0xf0]  ;;  %v950_v14 = vor.u32 %v1064_v6, %v949_v5 }
  0x2e   :  { %335 = vmatpush.bf16.msra.mxu1 %v762_v35  ;;  %v1063_v12 = vld [vmem:[#allocation2 + $0x8c] sm:$0xf]  ;;  %v959_v13 = vld [vmem:[#allocation2 + $0x98] sm:$0xf0]  ;;  %v933_v15 = vld [vmem:[#allocation2 + $0x60] sm:$0xf]  ;;  %v954_v16 = vor.u32 %v1062_v7, %v951_v9  ;;  %v958_v17 = vor.u32 %v1065_v11, %v957_v10 }
  0x2f   :  { %348 = vmatpush.bf16.msra.mxu2 %v766_v36  ;;  %361 = vmatpush.bf16.msra.mxu3 %v770_v40  ;;  %v1060_v18 = vld [vmem:[#allocation2 + $0x6c] sm:$0xf0]  ;;  %v1058_v19 = vld [vmem:[#allocation2 + $0x64] sm:$0xf]  ;;  %v935_v20 = vld [vmem:[#allocation2 + $0x70] sm:$0xf0]  ;;  %v962_v21 = vor.u32 %v1063_v12, %v959_v13 }
  0x30   :  { %323 = vmatmul.bf16.vlgmr.msra.gmra.mxu0 %v122_v51  ;;  %v941_v22 = vld [vmem:[#allocation2 + $0x68] sm:$0xf]  ;;  %v1061_v23 = vld [vmem:[#allocation2 + $0x74] sm:$0xf0]  ;;  %v1059_v24 = vld [vmem:[#allocation2 + $0x6c] sm:$0xf]  ;;  %v934_v26 = vor.u32 %v1060_v18, %v933_v15  ;;  %v938_v27 = vor.u32 %v1058_v19, %v935_v20 }
  0x31   :  { %527 = vmatpush.bf16.msrb.mxu0 %v998_v41  ;;  %336 = vmatmul.bf16.vlgmr.msra.gmra.mxu1 %v122_v51  ;;  %v943_v25 = vld [vmem:[#allocation2 + $0x78] sm:$0xf0]  ;;  %v942_v28 = vor.u32 %v1061_v23, %v941_v22  ;;  %v917_v29 = vld [vmem:[#allocation2 + $0x40] sm:$0xf]  ;;  %v1056_v30 = vld [vmem:[#allocation2 + $0x4c] sm:$0xf0] }
  0x32   :  { %540 = vmatpush.bf16.msrb.mxu1 %v1002_v42  ;;  %362 = vmatmul.bf16.vlgmr.msra.gmra.mxu3 %v122_v51  ;;  %v1054_v31 = vld [vmem:[#allocation2 + $0x44] sm:$0xf]  ;;  %v946_v32 = vor.u32 %v1059_v24, %v943_v25  ;;  %v919_v33 = vld [vmem:[#allocation2 + $0x50] sm:$0xf0]  ;;  %v925_v34 = vld [vmem:[#allocation2 + $0x48] sm:$0xf]  ;;  %v918_v38 = vor.u32 %v1056_v30, %v917_v29 }
  0x33   :  { %553 = vmatpush.bf16.msrb.mxu2 %v1006_v43  ;;  %566 = vmatpush.bf16.msrb.mxu3 %v1010_v47  ;;  %v1057_v35 = vld [vmem:[#allocation2 + $0x54] sm:$0xf0]  ;;  %v1055_v36 = vld [vmem:[#allocation2 + $0x4c] sm:$0xf]  ;;  %v927_v37 = vld [vmem:[#allocation2 + $0x58] sm:$0xf0]  ;;  %v922_v39 = vor.u32 %v1054_v31, %v919_v33 }
  0x34   :  { %349 = vmatmul.bf16.vlgmr.msra.gmra.mxu2 %v122_v51  ;;  %v926_v40 = vor.u32 %v1057_v35, %v925_v34  ;;  %v901_v41 = vld [vmem:[#allocation2 + $0x20] sm:$0xf]  ;;  %v1052_v42 = vld [vmem:[#allocation2 + $0x2c] sm:$0xf0]  ;;  %v1050_v43 = vld [vmem:[#allocation2 + $0x24] sm:$0xf]  ;;  %v930_v44 = vor.u32 %v1055_v36, %v927_v37 }
  0x35   :  { %528 = vmatpush.bf16.msrb.mxu0 %v982_v54  ;;  %v903_v45 = vld [vmem:[#allocation2 + $0x30] sm:$0xf0]  ;;  %v909_v46 = vld [vmem:[#allocation2 + $0x28] sm:$0xf]  ;;  %v1053_v47 = vld [vmem:[#allocation2 + $0x34] sm:$0xf0]  ;;  %v902_v50 = vor.u32 %v1052_v42, %v901_v41 }
  0x36   :  { %541 = vmatpush.bf16.msrb.mxu1 %v986_v55  ;;  %v1051_v48 = vld [vmem:[#allocation2 + $0x2c] sm:$0xf]  ;;  %v911_v49 = vld [vmem:[#allocation2 + $0x38] sm:$0xf0]  ;;  %v906_v51 = vor.u32 %v1050_v43, %v903_v45  ;;  %v910_v52 = vor.u32 %v1053_v47, %v909_v46  ;;  %v885_v53 = vld [vmem:[#allocation2] sm:$0xf] }
  0x37   :  { %554 = vmatpush.bf16.msrb.mxu2 %v990_v56  ;;  %567 = vmatpush.bf16.msrb.mxu3 %v994_v60  ;;  %v1048_v54 = vld [vmem:[#allocation2 + $0xc] sm:$0xf0]  ;;  %v1046_v55 = vld [vmem:[#allocation2 + $0x4] sm:$0xf]  ;;  %v914_v56 = vor.u32 %v1051_v48, %v911_v49  ;;  %v887_v57 = vld [vmem:[#allocation2 + $0x10] sm:$0xf0] }
  0x38   :  { %v893_v58 = vld [vmem:[#allocation2 + $0x8] sm:$0xf]  ;;  %v1049_v59 = vld [vmem:[#allocation2 + $0x14] sm:$0xf0]  ;;  %v1047_v60 = vld [vmem:[#allocation2 + $0xc] sm:$0xf]  ;;  %v886_v62 = vor.u32 %v1048_v54, %v885_v53  ;;  %v890_v63 = vor.u32 %v1046_v55, %v887_v57 }
  0x39   :  { %529 = vmatpush.bf16.msrb.mxu0 %v966_v2  ;;  %v895_v61 = vld [vmem:[#allocation2 + $0x18] sm:$0xf0]  ;;  %v894_v0 = vor.u32 %v1049_v59, %v893_v58  ;;  %v87_v2 = vld [vmem:[%s1313_s0] sm:$0xf]  ;;  %v1116_v12 = vld [vmem:[#allocation6 + $0x30] sm:$0xff] }
  0x3a   :  { %542 = vmatpush.bf16.msrb.mxu1 %v970_v3  ;;  %v898_v1 = vor.u32 %v1047_v60, %v895_v61  ;;  %v1117_v9 = vld [vmem:[#allocation6 + $0x38] sm:$0xff]  ;;  %v1115_v13 = vld [vmem:[#allocation6 + $0x28] sm:$0xff]  ;;  %v1114_v15 = vld [vmem:[#allocation6 + $0x20] sm:$0xff] }
  0x3b   :  { %555 = vmatpush.bf16.msrb.mxu2 %v974_v4  ;;  %568 = vmatpush.bf16.msrb.mxu3 %v978_v8  ;;  %v1111_v30 = vld [vmem:[#allocation6 + $0x8] sm:$0xff]  ;;  %v1110_v36 = vld [vmem:[#allocation6] sm:$0xff] }
  0x3d   :  { %530 = vmatpush.bf16.msrb.mxu0 %v950_v14  ;;  %v579_v14 = vld [vmem:[%s1318_s5] sm:$0xf] }
  0x3e   :  { %543 = vmatpush.bf16.msrb.mxu1 %v954_v16  ;;  %v581_v16 = vperm.slane %v579_v14, 0  ;;  %v582_v18 = vperm.slane %v579_v14, 1  ;;  %v584_v29 = vperm.slane %v579_v14, 3  ;;  %v583_v45 = vperm.slane %v579_v14, 2 }
  0x3f   :  { %556 = vmatpush.bf16.msrb.mxu2 %v958_v17  ;;  %569 = vmatpush.bf16.msrb.mxu3 %v962_v21  ;;  %v1113_v21 = vld [vmem:[#allocation6 + $0x18] sm:$0xff] }
  0x41   :  { %531 = vmatpush.bf16.msrb.mxu0 %v934_v26  ;;  %v1112_v26 = vld [vmem:[#allocation6 + $0x10] sm:$0xff] }
  0x42   :  { %544 = vmatpush.bf16.msrb.mxu1 %v938_v27 }
  0x43   :  { %557 = vmatpush.bf16.msrb.mxu2 %v942_v28  ;;  %570 = vmatpush.bf16.msrb.mxu3 %v946_v32 }
  0x45   :  { %532 = vmatpush.bf16.msrb.mxu0 %v918_v38 }
  0x46   :  { %545 = vmatpush.bf16.msrb.mxu1 %v922_v39 }
  0x47   :  { %558 = vmatpush.bf16.msrb.mxu2 %v926_v40  ;;  %571 = vmatpush.bf16.msrb.mxu3 %v930_v44 }
  0x49   :  { %533 = vmatpush.bf16.msrb.mxu0 %v902_v50 }
  0x4a   :  { %546 = vmatpush.bf16.msrb.mxu1 %v906_v51 }
  0x4b   :  { %559 = vmatpush.bf16.msrb.mxu2 %v910_v52  ;;  %572 = vmatpush.bf16.msrb.mxu3 %v914_v56 }
  0x4d   :  { %534 = vmatpush.bf16.msrb.mxu0 %v886_v62 }
  0x4e   :  { %547 = vmatpush.bf16.msrb.mxu1 %v890_v63 }
  0x4f   :  { %560 = vmatpush.bf16.msrb.mxu2 %v894_v0  ;;  %573 = vmatpush.bf16.msrb.mxu3 %v898_v1 }
  0x50   :  { %535 = vmatmul.bf16.vlgmr.msrb.gmra.mxu0 %v87_v2 }
  0x51   :  { %548 = vmatmul.bf16.vlgmr.msrb.gmra.mxu1 %v87_v2  ;;  %727 = vmatpush.bf16.msra.mxu0 %v1117_v9 }
  0x52   :  { %561 = vmatmul.bf16.vlgmr.msrb.gmra.mxu2 %v87_v2  ;;  %574 = vmatmul.bf16.vlgmr.msrb.gmra.mxu3 %v87_v2  ;;  %v85_v2 = vld [vmem:[%s1315_s2] sm:$0xff] }
  0x55   :  { %728 = vmatpush.bf16.msra.mxu0 %v1116_v12 }
  0x59   :  { %729 = vmatpush.bf16.msra.mxu0 %v1115_v13 }
  0x5d   :  { %730 = vmatpush.bf16.msra.mxu0 %v1114_v15 }
  0x61   :  { %731 = vmatpush.bf16.msra.mxu0 %v1113_v21 }
  0x65   :  { %732 = vmatpush.bf16.msra.mxu0 %v1112_v26 }
  0x69   :  { %733 = vmatpush.bf16.msra.mxu0 %v1111_v30 }
  0x6d   :  { %734 = vmatpush.bf16.msra.mxu0 %v1110_v36 }
  0xad   :  { %v324_v3 = vpop.f32.mrf.mxu0 }
  0xae   :  { %v337_v4 = vpop.f32.mrf.mxu1 }
  0xb5   :  { %v363_v5 = vpop.f32.mrf.mxu3  ;;  %v326_v6 = vpop.f32.mrf.mxu0 }
  0xb6   :  { %v339_v8 = vpop.f32.mrf.mxu1 }
  0xb7   :  { %v350_v7 = vpop.f32.mrf.mxu2 }
  0xbd   :  { %v365_v10 = vpop.f32.mrf.mxu3 }
  0xbf   :  { %v352_v11 = vpop.f32.mrf.mxu2 }
  0xcd   :  { %v536_v17 = vpop.f32.mrf.mxu0 }
  0xce   :  { %v537_v19 = vadd.f32 %v536_v17, %v324_v3  ;;  %v549_v20 = vpop.f32.mrf.mxu1 }
  0xcf   :  { %v550_v22 = vadd.f32 %v549_v20, %v337_v4 }
  0xd0   :  { %v589_v23 = vadd.f32 %v581_v16, %v537_v19 }
  0xd1   :  { %v590_v24 = vadd.f32 %v582_v18, %v550_v22 }
  0xd2   :  { %v1011_v25 = vmul.f32 -1.442695, %v589_v23  ;;  %v1125_v23 = vld [vmem:[%s1320_s7] ss:$0 sm:$0xff] }
  0xd3   :  { %v1012_v27 = vmul.f32 -1.442695, %v590_v24 }
  0xd4   :  { %1126 = vpow2.f32 %v1011_v25 }
  0xd5   :  { %v562_v28 = vpop.f32.mrf.mxu2  ;;  %1128 = vpow2.f32 %v1012_v27  ;;  %v575_v31 = vpop.f32.mrf.mxu3 }
  0xd6   :  { %v538_v32 = vpop.f32.mrf.mxu0  ;;  %v576_v33 = vadd.f32 %v575_v31, %v363_v5  ;;  %v551_v34 = vpop.f32.mrf.mxu1  ;;  %v563_v44 = vadd.f32 %v562_v28, %v350_v7 }
  0xd8   :  { %v592_v35 = vadd.f32 %v584_v29, %v576_v33  ;;  %v591_v48 = vadd.f32 %v583_v45, %v563_v44 }
  0xda   :  { %v1127_v37 = vpop.eup %1126  ;;  %v1013_v38 = vmul.f32 -1.442695, %v592_v35 }
  0xdb   :  { %v1129_v39 = vpop.eup %1128  ;;  %v596_v40 = vadd.f32 1.0, %v1127_v37 }
  0xdc   :  { %v615_v41 = vadd.f32 1.0, %v1129_v39  ;;  %1130 = vpow2.f32 %v1013_v38 }
  0xdd   :  { %v564_v42 = vpop.f32.mrf.mxu2  ;;  %1132 = vrcp.f32 %v596_v40  ;;  %v577_v43 = vpop.f32.mrf.mxu3  ;;  %v608_v55 = vand.u32 2147483648, %v596_v40  ;;  %v606_v58 = vand.u32 2147483647, %v596_v40  ;;  %vm602_vm2 = vweird.f32 %v596_v40 }
  0xde   :  { %1134 = vrcp.f32 %v615_v41  ;;  %v627_v56 = vand.u32 2147483648, %v615_v41  ;;  %v625_v60 = vand.u32 2147483647, %v615_v41  ;;  %vm621_vm3 = vweird.f32 %v615_v41 }
  0xdf   :  { %v609_v63 = vor.u32 1.1754944e-38, %v608_v55  ;;  %vm607_vm6 = vcmp.eq.f32.partialorder %v606_v58, 8.507059e+37 }
  0xe0   :  { %v628_v1 = vor.u32 1.1754944e-38, %v627_v56  ;;  %vm626_vm7 = vcmp.eq.f32.partialorder %v625_v60, 8.507059e+37 }
  0xe2   :  { %v1131_v46 = vpop.eup %1130 }
  0xe3   :  { %v1133_v47 = vpop.eup %1132  ;;  %v635_v49 = vadd.f32 1.0, %v1131_v46 }
  0xe4   :  { %v1135_v50 = vpop.eup %1134  ;;  %v598_v51 = vmul.f32 %v1133_v47, %v596_v40  ;;  %vm603_vm0 = vweird.f32 %v1133_v47 }
  0xe5   :  { %v617_v52 = vmul.f32 %v1135_v50, %v615_v41  ;;  %1136 = vrcp.f32 %v635_v49  ;;  %vm622_vm1 = vweird.f32 %v1135_v50  ;;  %vm604_vm4 = vmor %vm602_vm2, %vm603_vm0  ;;  %v647_v15 = vand.u32 2147483648, %v635_v49 }
  0xe6   :  { %v599_v53 = vsub.f32 1.0, %v598_v51  ;;  %1138 = vtanh.f32 %v591_v48  ;;  %vm623_vm5 = vmor %vm621_vm3, %vm622_vm1  ;;  %vm641_vm9 = vweird.f32 %v635_v49  ;;  %v645_v16 = vand.u32 2147483647, %v635_v49 }
  0xe7   :  { %v618_v54 = vsub.f32 1.0, %v617_v52  ;;  %v648_v18 = vor.u32 1.1754944e-38, %v647_v15 }
  0xe8   :  { %v600_v57 = vmul.f32 %v1133_v47, %v599_v53  ;;  %vm646_vm11 = vcmp.eq.f32.partialorder %v645_v16, 8.507059e+37 }
  0xe9   :  { %v619_v59 = vmul.f32 %v1135_v50, %v618_v54 }
  0xea   :  { %v601_v61 = vadd.f32 %v1133_v47, %v600_v57 }
  0xeb   :  { %v1137_v62 = vpop.eup %1136  ;;  %v620_v0 = vadd.f32 %v1135_v50, %v619_v59 }
  0xec   :  { %v605_v3 = vsel %vm604_vm4, %v1133_v47, %v601_v61  ;;  %v637_v4 = vmul.f32 %v1137_v62, %v635_v49  ;;  %v1139_v5 = vpop.eup %1138  ;;  %vm642_vm8 = vweird.f32 %v1137_v62 }
  0xed   :  { %v610_v6 = vsel %vm607_vm6, %v609_v63, %v605_v3  ;;  %v624_v7 = vsel %vm623_vm5, %v1135_v50, %v620_v0  ;;  %vm643_vm10 = vmor %vm641_vm9, %vm642_vm8 }
  0xee   :  { %v629_v8 = vsel %vm626_vm7, %v628_v1, %v624_v7  ;;  %v652_v9 = vmul.f32 %v1139_v5, %v610_v6  ;;  %v638_v10 = vsub.f32 1.0, %v637_v4 }
  0xef   :  { %v651_v11 = vmul.f32 %v629_v8, %v85_v2 }
  0xf0   :  { %v639_v12 = vmul.f32 %v1137_v62, %v638_v10 }
  0xf1   :  { %v653_v13 = vadd.f32 %v652_v9, %v651_v11 }
  0xf2   :  { %v640_v14 = vadd.f32 %v1137_v62, %v639_v12 }
  0xf3   :  { %1140 = vtanh.f32 %v653_v13  ;;  %656 = vst [vmem:[%s1323_s10] sm:$0xff] %v653_v13 }
  0xf4   :  { %v644_v17 = vsel %vm643_vm10, %v1137_v62, %v640_v14 }
  0xf5   :  { %v649_v20 = vsel %vm646_vm11, %v648_v18, %v644_v17 }
  0xf9   :  { %v1141_v19 = vpop.eup %1140 }
  0xfa   :  { %v655_v21 = vmul.f32 %v1141_v19, %v649_v20 }
  0xfc   :  { %657 = vst [vmem:[%s1322_s9] sm:$0xff] %v655_v21  ;;  %v658_v22 = vpack.c.bf16 %v655_v21, %v655_v21 }
  0xfe   :  { %735 = vmatmul.bf16.vlgmr.msra.gmra.mxu0 %v658_v22 }
 0x17b   :  { %v736_v24 = vpop.f32.mrf.mxu0 }
 0x17c   :  { %v737_v25 = vadd.f32 %v1125_v23, %v736_v24 }
 0x17e   :  { %740 = vst [vmem:[%s1321_s8] sm:$0xff] %v737_v25 }
 0x183   :  { %v738_v26 = vpop.f32.mrf.mxu0 }
 0x184   :  { %753 = vsyncpa [#allocation3], 1 }
 0x185   :  { %754 = vsyncpa [#allocation5], 1 }

</bundles_post_ra>
